<compile_context>
chip_gen: v5e
topology: v5e:2x2
jax: 0.10.0
libtpu: 0.0.40
codegen_flags: <defaults>
</compile_context>

<pallas_src>
import random
import numpy as np
import jax
import jax.numpy as jnp
from jax import lax
from jax.experimental import pallas as pl
from jax.experimental.pallas import tpu as pltpu

EMBDIM = 100        # matches the PyTorch module
D_PAD = 128         # lane-padded embedding width
ENTNUM = 40         # synthetic len(entity2id)
RELNUM = 12         # synthetic len(relation2id)
TILE_B = 128        # batch elements (lanes) processed per grid step


def _round_up(x, m):
    return (x + m - 1) // m * m


def _transe_kernel(ids_ref, ent_t_ref, rel_t_ref, out_ref):
    # ids_ref:   (8, TILE_B) int32 -- rows 0..4 = pos_h, pos_r, pos_t, neg_h, neg_t
    # ent_t_ref: (D_PAD, ENT_PAD) f32  (transposed, zero-padded entity table)
    # rel_t_ref: (D_PAD, REL_PAD) f32  (transposed, zero-padded relation table)
    # out_ref:   (2, TILE_B) f32 -- row 0 = pos scores, row 1 = neg scores
    ids = ids_ref[...]
    ent_t = ent_t_ref[...]
    rel_t = rel_t_ref[...]

    ent_pad = ent_t.shape[1]
    rel_pad = rel_t.shape[1]
    ent_iota = lax.broadcasted_iota(jnp.int32, (ent_pad, TILE_B), 0)
    rel_iota = lax.broadcasted_iota(jnp.int32, (rel_pad, TILE_B), 0)

    def gather(table_t, rows_iota, id_row):
        # One-hot gather on the MXU: exact row selection in f32.
        onehot = (rows_iota == id_row).astype(jnp.float32)        # (N_PAD, TILE_B)
        return jnp.dot(table_t, onehot,
                       preferred_element_type=jnp.float32)        # (D_PAD, TILE_B)

    p_h = gather(ent_t, ent_iota, ids[0:1, :])
    p_r = gather(rel_t, rel_iota, ids[1:2, :])   # n_r == p_r in the reference
    p_t = gather(ent_t, ent_iota, ids[2:3, :])
    n_h = gather(ent_t, ent_iota, ids[3:4, :])
    n_t = gather(ent_t, ent_iota, ids[4:5, :])

    # |h + r - t| summed over the embedding dim (sublane reduction -> lane-dense row).
    pos = jnp.sum(jnp.abs(p_h + p_r - p_t), axis=0, keepdims=True)   # (1, TILE_B)
    neg = jnp.sum(jnp.abs(n_h + p_r - n_t), axis=0, keepdims=True)   # (1, TILE_B)
    out_ref[...] = jnp.concatenate([pos, neg], axis=0)               # (2, TILE_B)


def transe_forward(ent_emb_t, rel_emb_t, pos_hID, pos_rID, pos_tID,
                   neg_tID, neg_hID, head):
    """Batched Pallas TransE forward.

    ent_emb_t: (D_PAD, ENT_PAD) transposed zero-padded entity table.
    rel_emb_t: (D_PAD, REL_PAD) transposed zero-padded relation table.
    head: Python bool replicating the host-side random corruption choice
          (baked in at trace time).
    """
    B = pos_hID.shape[0]
    if head:
        nh_ids, nt_ids = neg_hID, pos_tID
    else:
        nh_ids, nt_ids = pos_hID, neg_tID

    n_tiles = max(1, pl.cdiv(B, TILE_B))
    b_pad = n_tiles * TILE_B

    def pad_ids(x):
        return jnp.pad(x.astype(jnp.int32), (0, b_pad - B))

    ids = jnp.stack([pad_ids(pos_hID), pad_ids(pos_rID), pad_ids(pos_tID),
                     pad_ids(nh_ids), pad_ids(nt_ids)], axis=0)      # (5, B_PAD)
    ids = jnp.pad(ids, ((0, 3), (0, 0)))                             # (8, B_PAD)

    d_pad, ent_pad = ent_emb_t.shape
    _, rel_pad = rel_emb_t.shape

    grid_spec = pltpu.PrefetchScalarGridSpec(
        num_scalar_prefetch=0,
        grid=(n_tiles,),
        in_specs=[
            pl.BlockSpec((8, TILE_B), lambda i: (0, i)),
            pl.BlockSpec((d_pad, ent_pad), lambda i: (0, 0)),   # VMEM-resident table
            pl.BlockSpec((d_pad, rel_pad), lambda i: (0, 0)),   # VMEM-resident table
        ],
        out_specs=pl.BlockSpec((2, TILE_B), lambda i: (0, i)),
    )

    scores = pl.pallas_call(
        _transe_kernel,
        grid_spec=grid_spec,
        out_shape=jax.ShapeDtypeStruct((2, b_pad), jnp.float32),
        compiler_params=pltpu.CompilerParams(dimension_semantics=("parallel",)),
    )(ids, ent_emb_t, rel_emb_t)

    return scores[0, :B], scores[1, :B]


def _xavier_uniform(key, shape):
    fan_out, fan_in = shape  # torch xavier on Embedding weight: (num_embeddings, dim)
    bound = np.sqrt(6.0 / (fan_in + fan_out))
    return jax.random.uniform(key, shape, jnp.float32, -bound, bound)


if __name__ == "__main__":
    key = jax.random.PRNGKey(0)
    k_ent, k_rel, k_ids = jax.random.split(key, 3)

    ent_w = _xavier_uniform(k_ent, (ENTNUM, EMBDIM))
    rel_w = _xavier_uniform(k_rel, (RELNUM, EMBDIM))

    # Zero-pad rows/cols (padding contributes |0+0-0| = 0) and pre-transpose so the
    # kernel's one-hot matmul produces (D_PAD, TILE_B) embeddings directly.
    ent_pad_rows = _round_up(ENTNUM, 128)
    rel_pad_rows = _round_up(RELNUM, 128)
    ent_t = jnp.pad(ent_w, ((0, ent_pad_rows - ENTNUM), (0, D_PAD - EMBDIM))).T  # (128, 128)
    rel_t = jnp.pad(rel_w, ((0, rel_pad_rows - RELNUM), (0, D_PAD - EMBDIM))).T  # (128, 128)

    B = 8
    kk = jax.random.split(k_ids, 5)
    pos_h = jax.random.randint(kk[0], (B,), 0, ENTNUM, jnp.int32)
    pos_r = jax.random.randint(kk[1], (B,), 0, RELNUM, jnp.int32)
    pos_t = jax.random.randint(kk[2], (B,), 0, ENTNUM, jnp.int32)
    neg_t = jax.random.randint(kk[3], (B,), 0, ENTNUM, jnp.int32)
    neg_h = jax.random.randint(kk[4], (B,), 0, ENTNUM, jnp.int32)

    # Reproduce the module's host-side `random.sample([True, False], 1)[0]` deterministically.
    random.seed(0)
    head = random.sample([True, False], 1)[0]

    pos_score, neg_score = transe_forward(
        ent_t, rel_t, pos_h, pos_r, pos_t, neg_t, neg_h, head
    )
    jax.block_until_ready((pos_score, neg_score))

    # Pure-JAX reference (same semantics as the PyTorch forward).
    p_h = jnp.take(ent_w, pos_h, axis=0)
    p_r = jnp.take(rel_w, pos_r, axis=0)
    p_t = jnp.take(ent_w, pos_t, axis=0)
    if head:
        n_h = jnp.take(ent_w, neg_h, axis=0)
        n_t = jnp.take(ent_w, pos_t, axis=0)
    else:
        n_h = jnp.take(ent_w, pos_h, axis=0)
        n_t = jnp.take(ent_w, neg_t, axis=0)
    ref_pos = jnp.sum(jnp.abs(p_h + p_r - p_t), axis=1)
    ref_neg = jnp.sum(jnp.abs(n_h + p_r - n_t), axis=1)

    np.testing.assert_allclose(np.asarray(pos_score), np.asarray(ref_pos), rtol=1e-5, atol=1e-5)
    np.testing.assert_allclose(np.asarray(neg_score), np.asarray(ref_neg), rtol=1e-5, atol=1e-5)
    print("KERNEL_OK")
</pallas_src>

<mosaic_0001>
module attributes {stable_mosaic.version = 11 : i64} {
  func.func @_transe_kernel(%arg0: i32, %arg1: memref<8x128xi32, #tpu.memory_space<vmem>>, %arg2: memref<128x128xf32, #tpu.memory_space<vmem>>, %arg3: memref<128x128xf32, #tpu.memory_space<vmem>>, %arg4: memref<2x128xf32, #tpu.memory_space<vmem>>) attributes {dimension_semantics = [#tpu.dimension_semantics<parallel>], iteration_bounds = array<i64: 1>, scalar_prefetch = 0 : i64, scratch_operands = 0 : i64, tpu.core_type = #tpu.core_type<tc>, window_params = [{transform_indices = @transform_0, window_bounds = array<i64: 8, 128>}, {pipeline_mode = #tpu.pipeline_mode<synchronous>, transform_indices = @transform_1, window_bounds = array<i64: 128, 128>}, {pipeline_mode = #tpu.pipeline_mode<synchronous>, transform_indices = @transform_2, window_bounds = array<i64: 128, 128>}, {transform_indices = @transform_3, window_bounds = array<i64: 2, 128>}]} {
    %c0 = arith.constant 0 : index
    %c0_0 = arith.constant 0 : index
    %0 = vector.load %arg1[%c0, %c0_0] : memref<8x128xi32, #tpu.memory_space<vmem>>, vector<8x128xi32>
    %c0_1 = arith.constant 0 : index
    %c0_2 = arith.constant 0 : index
    %1 = vector.load %arg2[%c0_1, %c0_2] : memref<128x128xf32, #tpu.memory_space<vmem>>, vector<128x128xf32>
    %c0_3 = arith.constant 0 : index
    %c0_4 = arith.constant 0 : index
    %2 = vector.load %arg3[%c0_3, %c0_4] : memref<128x128xf32, #tpu.memory_space<vmem>>, vector<128x128xf32>
    %3 = tpu.iota {dimensions = array<i32: 0>} : vector<128x128xi32>
    %4 = tpu.iota {dimensions = array<i32: 0>} : vector<128x128xi32>
    %5 = vector.extract_strided_slice %0 {offsets = [0, 0], sizes = [1, 128], strides = [1, 1]} : vector<8x128xi32> to vector<1x128xi32>
    %6 = vector.broadcast %5 : vector<1x128xi32> to vector<128x128xi32>
    %7 = arith.cmpi eq, %3, %6 : vector<128x128xi32>
    %8 = arith.extui %7 : vector<128x128xi1> to vector<128x128xi32>
    %9 = arith.sitofp %8 : vector<128x128xi32> to vector<128x128xf32>
    %cst = arith.constant dense<0.000000e+00> : vector<128x128xf32>
    %10 = tpu.matmul %1, %9, %cst {dimension_numbers = #tpu.dot_dimension_numbers<[1], [0], [0], [1], [0, 0, 1, 1], [], []>} : vector<128x128xf32>, vector<128x128xf32>, vector<128x128xf32> -> vector<128x128xf32>
    %11 = vector.extract_strided_slice %0 {offsets = [1, 0], sizes = [1, 128], strides = [1, 1]} : vector<8x128xi32> to vector<1x128xi32>
    %12 = vector.broadcast %11 : vector<1x128xi32> to vector<128x128xi32>
    %13 = arith.cmpi eq, %4, %12 : vector<128x128xi32>
    %14 = arith.extui %13 : vector<128x128xi1> to vector<128x128xi32>
    %15 = arith.sitofp %14 : vector<128x128xi32> to vector<128x128xf32>
    %cst_5 = arith.constant dense<0.000000e+00> : vector<128x128xf32>
    %16 = tpu.matmul %2, %15, %cst_5 {dimension_numbers = #tpu.dot_dimension_numbers<[1], [0], [0], [1], [0, 0, 1, 1], [], []>} : vector<128x128xf32>, vector<128x128xf32>, vector<128x128xf32> -> vector<128x128xf32>
    %17 = vector.extract_strided_slice %0 {offsets = [2, 0], sizes = [1, 128], strides = [1, 1]} : vector<8x128xi32> to vector<1x128xi32>
    %18 = vector.broadcast %17 : vector<1x128xi32> to vector<128x128xi32>
    %19 = arith.cmpi eq, %3, %18 : vector<128x128xi32>
    %20 = arith.extui %19 : vector<128x128xi1> to vector<128x128xi32>
    %21 = arith.sitofp %20 : vector<128x128xi32> to vector<128x128xf32>
    %cst_6 = arith.constant dense<0.000000e+00> : vector<128x128xf32>
    %22 = tpu.matmul %1, %21, %cst_6 {dimension_numbers = #tpu.dot_dimension_numbers<[1], [0], [0], [1], [0, 0, 1, 1], [], []>} : vector<128x128xf32>, vector<128x128xf32>, vector<128x128xf32> -> vector<128x128xf32>
    %23 = vector.extract_strided_slice %0 {offsets = [3, 0], sizes = [1, 128], strides = [1, 1]} : vector<8x128xi32> to vector<1x128xi32>
    %24 = vector.broadcast %23 : vector<1x128xi32> to vector<128x128xi32>
    %25 = arith.cmpi eq, %3, %24 : vector<128x128xi32>
    %26 = arith.extui %25 : vector<128x128xi1> to vector<128x128xi32>
    %27 = arith.sitofp %26 : vector<128x128xi32> to vector<128x128xf32>
    %cst_7 = arith.constant dense<0.000000e+00> : vector<128x128xf32>
    %28 = tpu.matmul %1, %27, %cst_7 {dimension_numbers = #tpu.dot_dimension_numbers<[1], [0], [0], [1], [0, 0, 1, 1], [], []>} : vector<128x128xf32>, vector<128x128xf32>, vector<128x128xf32> -> vector<128x128xf32>
    %29 = vector.extract_strided_slice %0 {offsets = [4, 0], sizes = [1, 128], strides = [1, 1]} : vector<8x128xi32> to vector<1x128xi32>
    %30 = vector.broadcast %29 : vector<1x128xi32> to vector<128x128xi32>
    %31 = arith.cmpi eq, %3, %30 : vector<128x128xi32>
    %32 = arith.extui %31 : vector<128x128xi1> to vector<128x128xi32>
    %33 = arith.sitofp %32 : vector<128x128xi32> to vector<128x128xf32>
    %cst_8 = arith.constant dense<0.000000e+00> : vector<128x128xf32>
    %34 = tpu.matmul %1, %33, %cst_8 {dimension_numbers = #tpu.dot_dimension_numbers<[1], [0], [0], [1], [0, 0, 1, 1], [], []>} : vector<128x128xf32>, vector<128x128xf32>, vector<128x128xf32> -> vector<128x128xf32>
    %35 = arith.addf %10, %16 : vector<128x128xf32>
    %36 = arith.subf %35, %22 : vector<128x128xf32>
    %37 = math.absf %36 : vector<128x128xf32>
    %cst_9 = arith.constant dense<0.000000e+00> : vector<128xf32>
    %38 = vector.multi_reduction <add>, %37, %cst_9 [0] : vector<128x128xf32> to vector<128xf32>
    %39 = vector.shape_cast %38 : vector<128xf32> to vector<1x128xf32>
    %40 = arith.addf %28, %16 : vector<128x128xf32>
    %41 = arith.subf %40, %34 : vector<128x128xf32>
    %42 = math.absf %41 : vector<128x128xf32>
    %cst_10 = arith.constant dense<0.000000e+00> : vector<128xf32>
    %43 = vector.multi_reduction <add>, %42, %cst_10 [0] : vector<128x128xf32> to vector<128xf32>
    %44 = vector.shape_cast %43 : vector<128xf32> to vector<1x128xf32>
    %45 = tpu.concatenate %39, %44 in 0 : vector<1x128xf32>, vector<1x128xf32> -> vector<2x128xf32>
    %c0_11 = arith.constant 0 : index
    %c0_12 = arith.constant 0 : index
    %46 = vector.load %arg4[%c0_11, %c0_12] : memref<2x128xf32, #tpu.memory_space<vmem>>, vector<2x128xf32>
    tpu.vector_store %arg4[%c0_11, %c0_12], %45 {strides = array<i32>} : memref<2x128xf32, #tpu.memory_space<vmem>>, vector<2x128xf32>,
    return
  }
  func.func @transform_0(%arg0: i32) -> (i32, i32) {
    %c0_i32 = arith.constant 0 : i32
    %c0_i32_0 = arith.constant 0 : i32
    return %c0_i32, %arg0 : i32, i32
  }
  func.func @transform_1(%arg0: i32) -> (i32, i32) {
    %c0_i32 = arith.constant 0 : i32
    %c0_i32_0 = arith.constant 0 : i32
    %c0_i32_1 = arith.constant 0 : i32
    return %c0_i32, %c0_i32_0 : i32, i32
  }
  func.func @transform_2(%arg0: i32) -> (i32, i32) {
    %c0_i32 = arith.constant 0 : i32
    %c0_i32_0 = arith.constant 0 : i32
    %c0_i32_1 = arith.constant 0 : i32
    return %c0_i32, %c0_i32_0 : i32, i32
  }
  func.func @transform_3(%arg0: i32) -> (i32, i32) {
    %c0_i32 = arith.constant 0 : i32
    %c0_i32_0 = arith.constant 0 : i32
    return %c0_i32, %arg0 : i32, i32
  }
}

</mosaic_0001>

<bundles_post_ra>
// kernel: tpu_custom_call.1
= control target key start
LH: loop header
LB: loop body
LE: loop exit
PB: predicated region body
PF: predicated region fallthrough
CT: control target
= control target key end

     0   :  { %8 = vsyncpa [#allocation3], 0  ;;  %s1587_s0 = inlined_call_operand.hbm [shape: s32[8,128], index: 0, kind: input, shape index: {}]   ;;  %s1588_s1 = inlined_call_operand.hbm [shape: f32[128,128], index: 1, kind: input, shape index: {}]   ;;  %s1589_s2 = inlined_call_operand.hbm [shape: f32[128,128], index: 2, kind: input, shape index: {}]   ;;  %s1590_s3 = inlined_call_operand.hbm [shape: f32[2,128], index: 3, kind: output, shape index: {}]  }
   0x1   :  { %9 = vsyncpa [#allocation6], 0  ;;  %s26_s14 = sshll.u32 %s1588_s1, 4  ;;  %s27_s14 = int_to_ptr.hbm [resolvable:$true] %s26_s14 }
   0x2   :  { %10 = vsyncpa [#allocation4], 0  ;;  %s1124_s15 = smov [#allocation5]   ;;  %s16_s19 = sshll.u32 %s1587_s0, 4  ;;  %s17_s19 = int_to_ptr.hbm [resolvable:$true] %s16_s19 }
   0x3   :  { %s28_s16 = sshll.u32 %s1124_s15, 4  ;;  %s1125_s20 = smov 128   ;;  %s29_s16 = int_to_ptr.vmem [resolvable:$true] %s28_s16 }
   0x4   :  { %s1126_s21 = smov 8   ;;  %s1127_s22 = smov [#allocation2]  }
   0x5   :  { %34 = dma.hbm_to_vmem [thread:$0]  %s27_s14, 2048, %s29_s16, [#allocation6], %s1125_s20, %s1125_s20, %s1126_s21  }
   0x6   :  { %s18_s23 = sshll.u32 %s1127_s22, 4  ;;  %s39_s26 = sshll.u32 %s1589_s2, 4  ;;  %s19_s23 = int_to_ptr.vmem [resolvable:$true] %s18_s23  ;;  %s40_s26 = int_to_ptr.hbm [resolvable:$true] %s39_s26 }
   0x7   :  { %21 = dma.hbm_to_vmem [thread:$0]  %s17_s19, 128, %s19_s23, [#allocation3]  }
   0x8   :  { %s1128_s1 = smov [#allocation7]  }
   0x9   :  { %s41_s27 = sshll.u32 %s1128_s1, 4  ;;  %s42_s27 = int_to_ptr.vmem [resolvable:$true] %s41_s27 }
   0xa   :  { %47 = dma.hbm_to_vmem [thread:$0]  %s40_s26, 2048, %s42_s27, [#allocation6], %s1125_s20, %s1125_s20, %s1126_s21  }
   0xb   :  { %1118 = dma.done.wait [#allocation3], 128  }
   0xc   :  { %1119 = vsyncadd [#allocation3], 4294967168 }
   0xd   :  { %1120 = dma.done.wait [#allocation6], 4096  }
   0xe   :  { %1121 = vsyncadd [#allocation6], 4294963200  ;;  %v93_v0 = vlaneseq  ;;  %v1168_v4 = vld [vmem:[#allocation2] sm:$0xff]  ;;  %v1129_v8 = vmov 1.0   ;;  %v77_v23 = vld [vmem:[#allocation7] sm:$0xff]  ;;  %s1130_s0 = smov [#allocation8]  }
   0xf   :  { %v1171_v5 = vperm.slane %v1168_v4, 1  ;;  %v1297_v20 = vperm.slane %v1168_v4, 0  ;;  %v1300_v21 = vperm.slane %v1168_v4, 4  ;;  %v1306_v22 = vperm.slane %v1168_v4, 3  ;;  %v85_v24 = vld [vmem:[#allocation7 + $0x40] sm:$0xff]  ;;  %v86_v28 = vld [vmem:[#allocation7 + $0x48] sm:$0xff] }
  0x10   :  { %v1160_v1 = vshrl.u32 %v93_v0, 7  ;;  %v89_v25 = vld [vmem:[#allocation7 + $0x60] sm:$0xff]  ;;  %v1344_v26 = vperm.slane %v1168_v4, 2  ;;  %v78_v29 = vld [vmem:[#allocation7 + $0x8] sm:$0xff]  ;;  %v79_v32 = vld [vmem:[#allocation7 + $0x10] sm:$0xff]  ;;  %s794_s2 = sshll.u32 %s1130_s0, 4  ;;  %s795_s2 = int_to_ptr.vmem [resolvable:$true] %s794_s2 }
  0x11   :  { %v81_v27 = vld [vmem:[#allocation7 + $0x20] sm:$0xff]  ;;  %v90_v30 = vld [vmem:[#allocation7 + $0x68] sm:$0xff]  ;;  %v87_v33 = vld [vmem:[#allocation7 + $0x50] sm:$0xff]  ;;  %s796_s30 = sshll.u32 %s1590_s3, 4  ;;  %s797_s30 = int_to_ptr.hbm [resolvable:$true] %s796_s30 }
  0x12   :  { %v1163_v2 = vadd.s32 120, %v1160_v1  ;;  %v1166_v3 = vadd.s32 112, %v1160_v1  ;;  %v1174_v6 = vadd.s32 104, %v1160_v1  ;;  %v1181_v7 = vadd.s32 96, %v1160_v1  ;;  %v82_v31 = vld [vmem:[#allocation7 + $0x28] sm:$0xff]  ;;  %v91_v34 = vld [vmem:[#allocation7 + $0x70] sm:$0xff] }
  0x13   :  { %v1190_v9 = vadd.s32 88, %v1160_v1  ;;  %v1199_v10 = vadd.s32 80, %v1160_v1  ;;  %v1208_v11 = vadd.s32 72, %v1160_v1  ;;  %v1217_v12 = vadd.s32 64, %v1160_v1  ;;  %v83_v35 = vld [vmem:[#allocation7 + $0x30] sm:$0xff]  ;;  %v80_v36 = vld [vmem:[#allocation7 + $0x18] sm:$0xff] }
  0x14   :  { %vm175_vm0 = vcmp.eq.s32.totalorder %v1163_v2, %v1171_v5  ;;  %vm174_vm1 = vcmp.eq.s32.totalorder %v1166_v3, %v1171_v5  ;;  %vm173_vm2 = vcmp.eq.s32.totalorder %v1174_v6, %v1171_v5  ;;  %vm172_vm3 = vcmp.eq.s32.totalorder %v1181_v7, %v1171_v5  ;;  %v88_v37 = vld [vmem:[#allocation7 + $0x58] sm:$0xff]  ;;  %v61_v40 = vld [vmem:[#allocation5] sm:$0xff]  ;;  %v62_v41 = vld [vmem:[#allocation5 + $0x8] sm:$0xff] }
  0x15   :  { %839 = vmatpush.msk.msra.mxu0 %vm175_vm0, %v1129_v8  ;;  %968 = vmatpush.msk.msra.mxu2 %vm175_vm0, %v1129_v8  ;;  %vm171_vm4 = vcmp.eq.s32.totalorder %v1190_v9, %v1171_v5  ;;  %vm170_vm5 = vcmp.eq.s32.totalorder %v1199_v10, %v1171_v5  ;;  %vm169_vm6 = vcmp.eq.s32.totalorder %v1208_v11, %v1171_v5  ;;  %v1226_v13 = vadd.s32 56, %v1160_v1  ;;  %v92_v38 = vld [vmem:[#allocation7 + $0x78] sm:$0xff]  ;;  %v63_v42 = vld [vmem:[#allocation5 + $0x10] sm:$0xff]  ;;  %v65_v44 = vld [vmem:[#allocation5 + $0x20] sm:$0xff] }
  0x16   :  { %969 = vmatpush.msk.msra.mxu3 %vm175_vm0, %v1129_v8  ;;  %967 = vmatpush.msk.msra.mxu1 %vm175_vm0, %v1129_v8  ;;  %vm168_vm7 = vcmp.eq.s32.totalorder %v1217_v12, %v1171_v5  ;;  %v1235_v14 = vadd.s32 48, %v1160_v1  ;;  %v1244_v15 = vadd.s32 40, %v1160_v1  ;;  %v1253_v16 = vadd.s32 32, %v1160_v1  ;;  %v84_v39 = vld [vmem:[#allocation7 + $0x38] sm:$0xff]  ;;  %v66_v45 = vld [vmem:[#allocation5 + $0x28] sm:$0xff]  ;;  %v67_v46 = vld [vmem:[#allocation5 + $0x30] sm:$0xff] }
  0x17   :  { %840 = vmatpush.msk.msra.mxu0 %vm174_vm1, %v1129_v8  ;;  %971 = vmatpush.msk.msra.mxu2 %vm174_vm1, %v1129_v8  ;;  %vm167_vm8 = vcmp.eq.s32.totalorder %v1226_v13, %v1171_v5  ;;  %v1262_v17 = vadd.s32 24, %v1160_v1  ;;  %v1271_v18 = vadd.s32 16, %v1160_v1  ;;  %v1280_v19 = vadd.s32 8, %v1160_v1  ;;  %v64_v43 = vld [vmem:[#allocation5 + $0x18] sm:$0xff]  ;;  %v69_v48 = vld [vmem:[#allocation5 + $0x40] sm:$0xff]  ;;  %v70_v49 = vld [vmem:[#allocation5 + $0x48] sm:$0xff] }
  0x18   :  { %972 = vmatpush.msk.msra.mxu3 %vm174_vm1, %v1129_v8  ;;  %970 = vmatpush.msk.msra.mxu1 %vm174_vm1, %v1129_v8  ;;  %vm166_vm9 = vcmp.eq.s32.totalorder %v1235_v14, %v1171_v5  ;;  %vm165_vm10 = vcmp.eq.s32.totalorder %v1244_v15, %v1171_v5  ;;  %vm164_vm11 = vcmp.eq.s32.totalorder %v1253_v16, %v1171_v5  ;;  %v68_v47 = vld [vmem:[#allocation5 + $0x38] sm:$0xff]  ;;  %v71_v50 = vld [vmem:[#allocation5 + $0x50] sm:$0xff]  ;;  %v73_v53 = vld [vmem:[#allocation5 + $0x60] sm:$0xff] }
  0x19   :  { %841 = vmatpush.msk.msra.mxu0 %vm173_vm2, %v1129_v8  ;;  %974 = vmatpush.msk.msra.mxu2 %vm173_vm2, %v1129_v8  ;;  %vm163_vm12 = vcmp.eq.s32.totalorder %v1262_v17, %v1171_v5  ;;  %vm162_vm13 = vcmp.eq.s32.totalorder %v1271_v18, %v1171_v5  ;;  %vm161_vm14 = vcmp.eq.s32.totalorder %v1280_v19, %v1171_v5  ;;  %v72_v51 = vld [vmem:[#allocation5 + $0x58] sm:$0xff]  ;;  %v74_v58 = vld [vmem:[#allocation5 + $0x68] sm:$0xff]  ;;  %v75_v63 = vld [vmem:[#allocation5 + $0x70] sm:$0xff] }
  0x1a   :  { %975 = vmatpush.msk.msra.mxu3 %vm173_vm2, %v1129_v8  ;;  %973 = vmatpush.msk.msra.mxu1 %vm173_vm2, %v1129_v8  ;;  %vm160_vm15 = vcmp.eq.s32.totalorder %v1160_v1, %v1171_v5  ;;  %vm126_vm0 = vcmp.eq.s32.totalorder %v1163_v2, %v1297_v20  ;;  %vm452_vm1 = vcmp.eq.s32.totalorder %v1163_v2, %v1300_v21  ;;  %v76_v4 = vld [vmem:[#allocation5 + $0x78] sm:$0xff] }
  0x1b   :  { %842 = vmatpush.msk.msra.mxu0 %vm172_vm3, %v1129_v8  ;;  %977 = vmatpush.msk.msra.mxu2 %vm172_vm3, %v1129_v8  ;;  %vm403_vm2 = vcmp.eq.s32.totalorder %v1163_v2, %v1306_v22 }
  0x1c   :  { %978 = vmatpush.msk.msra.mxu3 %vm172_vm3, %v1129_v8  ;;  %976 = vmatpush.msk.msra.mxu1 %vm172_vm3, %v1129_v8  ;;  %vm125_vm3 = vcmp.eq.s32.totalorder %v1166_v3, %v1297_v20 }
  0x1d   :  { %843 = vmatpush.msk.msra.mxu0 %vm171_vm4, %v1129_v8  ;;  %980 = vmatpush.msk.msra.mxu2 %vm171_vm4, %v1129_v8 }
  0x1e   :  { %981 = vmatpush.msk.msra.mxu3 %vm171_vm4, %v1129_v8  ;;  %979 = vmatpush.msk.msra.mxu1 %vm171_vm4, %v1129_v8  ;;  %vm451_vm4 = vcmp.eq.s32.totalorder %v1166_v3, %v1300_v21 }
  0x1f   :  { %844 = vmatpush.msk.msra.mxu0 %vm170_vm5, %v1129_v8  ;;  %983 = vmatpush.msk.msra.mxu2 %vm170_vm5, %v1129_v8 }
  0x20   :  { %984 = vmatpush.msk.msra.mxu3 %vm170_vm5, %v1129_v8  ;;  %982 = vmatpush.msk.msra.mxu1 %vm170_vm5, %v1129_v8  ;;  %vm402_vm5 = vcmp.eq.s32.totalorder %v1166_v3, %v1306_v22 }
  0x21   :  { %845 = vmatpush.msk.msra.mxu0 %vm169_vm6, %v1129_v8  ;;  %986 = vmatpush.msk.msra.mxu2 %vm169_vm6, %v1129_v8 }
  0x22   :  { %987 = vmatpush.msk.msra.mxu3 %vm169_vm6, %v1129_v8  ;;  %985 = vmatpush.msk.msra.mxu1 %vm169_vm6, %v1129_v8  ;;  %vm124_vm6 = vcmp.eq.s32.totalorder %v1174_v6, %v1297_v20 }
  0x23   :  { %846 = vmatpush.msk.msra.mxu0 %vm168_vm7, %v1129_v8  ;;  %989 = vmatpush.msk.msra.mxu2 %vm168_vm7, %v1129_v8 }
  0x24   :  { %990 = vmatpush.msk.msra.mxu3 %vm168_vm7, %v1129_v8  ;;  %988 = vmatpush.msk.msra.mxu1 %vm168_vm7, %v1129_v8  ;;  %vm450_vm7 = vcmp.eq.s32.totalorder %v1174_v6, %v1300_v21 }
  0x25   :  { %847 = vmatpush.msk.msra.mxu0 %vm167_vm8, %v1129_v8  ;;  %992 = vmatpush.msk.msra.mxu2 %vm167_vm8, %v1129_v8 }
  0x26   :  { %993 = vmatpush.msk.msra.mxu3 %vm167_vm8, %v1129_v8  ;;  %991 = vmatpush.msk.msra.mxu1 %vm167_vm8, %v1129_v8  ;;  %vm401_vm8 = vcmp.eq.s32.totalorder %v1174_v6, %v1306_v22 }
  0x27   :  { %848 = vmatpush.msk.msra.mxu0 %vm166_vm9, %v1129_v8  ;;  %995 = vmatpush.msk.msra.mxu2 %vm166_vm9, %v1129_v8 }
  0x28   :  { %996 = vmatpush.msk.msra.mxu3 %vm166_vm9, %v1129_v8  ;;  %994 = vmatpush.msk.msra.mxu1 %vm166_vm9, %v1129_v8  ;;  %vm289_vm9 = vcmp.eq.s32.totalorder %v1163_v2, %v1344_v26 }
  0x29   :  { %849 = vmatpush.msk.msra.mxu0 %vm165_vm10, %v1129_v8  ;;  %998 = vmatpush.msk.msra.mxu2 %vm165_vm10, %v1129_v8 }
  0x2a   :  { %999 = vmatpush.msk.msra.mxu3 %vm165_vm10, %v1129_v8  ;;  %997 = vmatpush.msk.msra.mxu1 %vm165_vm10, %v1129_v8  ;;  %vm123_vm10 = vcmp.eq.s32.totalorder %v1181_v7, %v1297_v20 }
  0x2b   :  { %850 = vmatpush.msk.msra.mxu0 %vm164_vm11, %v1129_v8  ;;  %1001 = vmatpush.msk.msra.mxu2 %vm164_vm11, %v1129_v8 }
  0x2c   :  { %1002 = vmatpush.msk.msra.mxu3 %vm164_vm11, %v1129_v8  ;;  %1000 = vmatpush.msk.msra.mxu1 %vm164_vm11, %v1129_v8  ;;  %vm449_vm11 = vcmp.eq.s32.totalorder %v1181_v7, %v1300_v21 }
  0x2d   :  { %851 = vmatpush.msk.msra.mxu0 %vm163_vm12, %v1129_v8  ;;  %1004 = vmatpush.msk.msra.mxu2 %vm163_vm12, %v1129_v8 }
  0x2e   :  { %1005 = vmatpush.msk.msra.mxu3 %vm163_vm12, %v1129_v8  ;;  %1003 = vmatpush.msk.msra.mxu1 %vm163_vm12, %v1129_v8  ;;  %vm400_vm12 = vcmp.eq.s32.totalorder %v1181_v7, %v1306_v22 }
  0x2f   :  { %852 = vmatpush.msk.msra.mxu0 %vm162_vm13, %v1129_v8  ;;  %1007 = vmatpush.msk.msra.mxu2 %vm162_vm13, %v1129_v8 }
  0x30   :  { %1008 = vmatpush.msk.msra.mxu3 %vm162_vm13, %v1129_v8  ;;  %1006 = vmatpush.msk.msra.mxu1 %vm162_vm13, %v1129_v8  ;;  %vm122_vm13 = vcmp.eq.s32.totalorder %v1190_v9, %v1297_v20 }
  0x31   :  { %853 = vmatpush.msk.msra.mxu0 %vm161_vm14, %v1129_v8  ;;  %1010 = vmatpush.msk.msra.mxu2 %vm161_vm14, %v1129_v8 }
  0x32   :  { %1011 = vmatpush.msk.msra.mxu3 %vm161_vm14, %v1129_v8  ;;  %1009 = vmatpush.msk.msra.mxu1 %vm161_vm14, %v1129_v8  ;;  %vm448_vm14 = vcmp.eq.s32.totalorder %v1190_v9, %v1300_v21 }
  0x33   :  { %854 = vmatpush.msk.msra.mxu0 %vm160_vm15, %v1129_v8  ;;  %1013 = vmatpush.msk.msra.mxu2 %vm160_vm15, %v1129_v8 }
  0x34   :  { %1014 = vmatpush.msk.msra.mxu3 %vm160_vm15, %v1129_v8  ;;  %224 = vmatmul.f32.vlgmr.msra.gmra.mxu0 %v77_v23 }
  0x35   :  { %248 = vmatmul.f32.vlgmr.msra.gmra.mxu2 %v85_v24  ;;  %260 = vmatmul.f32.vlgmr.msra.gmra.mxu3 %v89_v25 }
  0x36   :  { %935 = vmatpush.msk.msrb.mxu3 %vm126_vm0, %v1129_v8  ;;  %919 = vmatpush.msk.msrb.mxu2 %vm452_vm1, %v1129_v8  ;;  %vm288_vm0 = vcmp.eq.s32.totalorder %v1166_v3, %v1344_v26  ;;  %vm121_vm1 = vcmp.eq.s32.totalorder %v1199_v10, %v1297_v20 }
  0x37   :  { %951 = vmatpush.msk.msrb.mxu0 %vm403_vm2, %v1129_v8  ;;  %1012 = vmatpush.msk.msra.mxu1 %vm160_vm15, %v1129_v8  ;;  %vm399_vm15 = vcmp.eq.s32.totalorder %v1190_v9, %v1306_v22  ;;  %vm447_vm2 = vcmp.eq.s32.totalorder %v1199_v10, %v1300_v21 }
  0x38   :  { %936 = vmatpush.msk.msrb.mxu3 %vm125_vm3, %v1129_v8  ;;  %920 = vmatpush.msk.msrb.mxu2 %vm451_vm4, %v1129_v8  ;;  %vm398_vm3 = vcmp.eq.s32.totalorder %v1199_v10, %v1306_v22  ;;  %vm287_vm4 = vcmp.eq.s32.totalorder %v1174_v6, %v1344_v26 }
  0x39   :  { %952 = vmatpush.msk.msrb.mxu0 %vm402_vm5, %v1129_v8  ;;  %236 = vmatmul.f32.vlgmr.msra.gmra.mxu1 %v81_v27  ;;  %vm120_vm5 = vcmp.eq.s32.totalorder %v1208_v11, %v1297_v20 }
  0x3a   :  { %937 = vmatpush.msk.msrb.mxu3 %vm124_vm6, %v1129_v8  ;;  %921 = vmatpush.msk.msrb.mxu2 %vm450_vm7, %v1129_v8  ;;  %vm446_vm6 = vcmp.eq.s32.totalorder %v1208_v11, %v1300_v21  ;;  %vm397_vm7 = vcmp.eq.s32.totalorder %v1208_v11, %v1306_v22 }
  0x3b   :  { %953 = vmatpush.msk.msrb.mxu0 %vm401_vm8, %v1129_v8  ;;  %871 = vmatpush.msk.msrb.mxu1 %vm289_vm9, %v1129_v8  ;;  %vm286_vm8 = vcmp.eq.s32.totalorder %v1181_v7, %v1344_v26  ;;  %vm119_vm9 = vcmp.eq.s32.totalorder %v1217_v12, %v1297_v20 }
  0x3c   :  { %938 = vmatpush.msk.msrb.mxu3 %vm123_vm10, %v1129_v8  ;;  %922 = vmatpush.msk.msrb.mxu2 %vm449_vm11, %v1129_v8  ;;  %vm445_vm10 = vcmp.eq.s32.totalorder %v1217_v12, %v1300_v21  ;;  %vm396_vm11 = vcmp.eq.s32.totalorder %v1217_v12, %v1306_v22 }
  0x3d   :  { %954 = vmatpush.msk.msrb.mxu0 %vm400_vm12, %v1129_v8  ;;  %251 = vmatmul.f32.gmra.mxu2 %v86_v28  ;;  %vm285_vm12 = vcmp.eq.s32.totalorder %v1190_v9, %v1344_v26 }
  0x3e   :  { %227 = vmatmul.f32.gmra.mxu0 %v78_v29  ;;  %263 = vmatmul.f32.gmra.mxu3 %v90_v30 }
  0x3f   :  { %939 = vmatpush.msk.msrb.mxu3 %vm122_vm13, %v1129_v8  ;;  %923 = vmatpush.msk.msrb.mxu2 %vm448_vm14, %v1129_v8  ;;  %vm118_vm13 = vcmp.eq.s32.totalorder %v1226_v13, %v1297_v20  ;;  %vm444_vm14 = vcmp.eq.s32.totalorder %v1226_v13, %v1300_v21 }
  0x40   :  { %955 = vmatpush.msk.msrb.mxu0 %vm399_vm15, %v1129_v8  ;;  %872 = vmatpush.msk.msrb.mxu1 %vm288_vm0, %v1129_v8  ;;  %vm395_vm15 = vcmp.eq.s32.totalorder %v1226_v13, %v1306_v22  ;;  %vm284_vm0 = vcmp.eq.s32.totalorder %v1199_v10, %v1344_v26 }
  0x41   :  { %940 = vmatpush.msk.msrb.mxu3 %vm121_vm1, %v1129_v8  ;;  %924 = vmatpush.msk.msrb.mxu2 %vm447_vm2, %v1129_v8  ;;  %vm117_vm1 = vcmp.eq.s32.totalorder %v1235_v14, %v1297_v20  ;;  %vm443_vm2 = vcmp.eq.s32.totalorder %v1235_v14, %v1300_v21 }
  0x42   :  { %956 = vmatpush.msk.msrb.mxu0 %vm398_vm3, %v1129_v8  ;;  %873 = vmatpush.msk.msrb.mxu1 %vm287_vm4, %v1129_v8  ;;  %vm394_vm3 = vcmp.eq.s32.totalorder %v1235_v14, %v1306_v22  ;;  %vm283_vm4 = vcmp.eq.s32.totalorder %v1208_v11, %v1344_v26 }
  0x43   :  { %941 = vmatpush.msk.msrb.mxu3 %vm120_vm5, %v1129_v8  ;;  %925 = vmatpush.msk.msrb.mxu2 %vm446_vm6, %v1129_v8  ;;  %vm116_vm5 = vcmp.eq.s32.totalorder %v1244_v15, %v1297_v20  ;;  %vm442_vm6 = vcmp.eq.s32.totalorder %v1244_v15, %v1300_v21 }
  0x44   :  { %957 = vmatpush.msk.msrb.mxu0 %vm397_vm7, %v1129_v8  ;;  %874 = vmatpush.msk.msrb.mxu1 %vm286_vm8, %v1129_v8  ;;  %vm393_vm7 = vcmp.eq.s32.totalorder %v1244_v15, %v1306_v22  ;;  %vm282_vm8 = vcmp.eq.s32.totalorder %v1217_v12, %v1344_v26 }
  0x45   :  { %942 = vmatpush.msk.msrb.mxu3 %vm119_vm9, %v1129_v8  ;;  %926 = vmatpush.msk.msrb.mxu2 %vm445_vm10, %v1129_v8  ;;  %vm115_vm9 = vcmp.eq.s32.totalorder %v1253_v16, %v1297_v20  ;;  %vm441_vm10 = vcmp.eq.s32.totalorder %v1253_v16, %v1300_v21 }
  0x46   :  { %958 = vmatpush.msk.msrb.mxu0 %vm396_vm11, %v1129_v8  ;;  %239 = vmatmul.f32.gmra.mxu1 %v82_v31  ;;  %vm392_vm11 = vcmp.eq.s32.totalorder %v1253_v16, %v1306_v22 }
  0x47   :  { %230 = vmatmul.f32.gmra.mxu0 %v79_v32  ;;  %254 = vmatmul.f32.gmra.mxu2 %v87_v33 }
  0x48   :  { %266 = vmatmul.f32.gmra.mxu3 %v91_v34  ;;  %875 = vmatpush.msk.msrb.mxu1 %vm285_vm12, %v1129_v8  ;;  %vm281_vm12 = vcmp.eq.s32.totalorder %v1226_v13, %v1344_v26 }
  0x49   :  { %943 = vmatpush.msk.msrb.mxu3 %vm118_vm13, %v1129_v8  ;;  %927 = vmatpush.msk.msrb.mxu2 %vm444_vm14, %v1129_v8  ;;  %vm114_vm13 = vcmp.eq.s32.totalorder %v1262_v17, %v1297_v20  ;;  %vm440_vm14 = vcmp.eq.s32.totalorder %v1262_v17, %v1300_v21 }
  0x4a   :  { %959 = vmatpush.msk.msrb.mxu0 %vm395_vm15, %v1129_v8  ;;  %876 = vmatpush.msk.msrb.mxu1 %vm284_vm0, %v1129_v8  ;;  %vm391_vm15 = vcmp.eq.s32.totalorder %v1262_v17, %v1306_v22  ;;  %vm280_vm0 = vcmp.eq.s32.totalorder %v1235_v14, %v1344_v26 }
  0x4b   :  { %944 = vmatpush.msk.msrb.mxu3 %vm117_vm1, %v1129_v8  ;;  %928 = vmatpush.msk.msrb.mxu2 %vm443_vm2, %v1129_v8  ;;  %vm113_vm1 = vcmp.eq.s32.totalorder %v1271_v18, %v1297_v20  ;;  %vm439_vm2 = vcmp.eq.s32.totalorder %v1271_v18, %v1300_v21 }
  0x4c   :  { %960 = vmatpush.msk.msrb.mxu0 %vm394_vm3, %v1129_v8  ;;  %877 = vmatpush.msk.msrb.mxu1 %vm283_vm4, %v1129_v8  ;;  %vm390_vm3 = vcmp.eq.s32.totalorder %v1271_v18, %v1306_v22  ;;  %vm279_vm4 = vcmp.eq.s32.totalorder %v1244_v15, %v1344_v26 }
  0x4d   :  { %945 = vmatpush.msk.msrb.mxu3 %vm116_vm5, %v1129_v8  ;;  %929 = vmatpush.msk.msrb.mxu2 %vm442_vm6, %v1129_v8  ;;  %vm112_vm5 = vcmp.eq.s32.totalorder %v1280_v19, %v1297_v20  ;;  %vm438_vm6 = vcmp.eq.s32.totalorder %v1280_v19, %v1300_v21 }
  0x4e   :  { %961 = vmatpush.msk.msrb.mxu0 %vm393_vm7, %v1129_v8  ;;  %878 = vmatpush.msk.msrb.mxu1 %vm282_vm8, %v1129_v8  ;;  %vm389_vm7 = vcmp.eq.s32.totalorder %v1280_v19, %v1306_v22  ;;  %vm278_vm8 = vcmp.eq.s32.totalorder %v1253_v16, %v1344_v26 }
  0x4f   :  { %946 = vmatpush.msk.msrb.mxu3 %vm115_vm9, %v1129_v8  ;;  %930 = vmatpush.msk.msrb.mxu2 %vm441_vm10, %v1129_v8  ;;  %vm111_vm9 = vcmp.eq.s32.totalorder %v1160_v1, %v1297_v20  ;;  %vm437_vm10 = vcmp.eq.s32.totalorder %v1160_v1, %v1300_v21 }
  0x50   :  { %962 = vmatpush.msk.msrb.mxu0 %vm392_vm11, %v1129_v8  ;;  %242 = vmatmul.f32.gmra.mxu1 %v83_v35  ;;  %vm388_vm11 = vcmp.eq.s32.totalorder %v1160_v1, %v1306_v22 }
  0x51   :  { %233 = vmatmul.f32.gmra.mxu0 %v80_v36  ;;  %257 = vmatmul.f32.gmra.mxu2 %v88_v37 }
  0x52   :  { %269 = vmatmul.f32.gmra.mxu3 %v92_v38  ;;  %879 = vmatpush.msk.msrb.mxu1 %vm281_vm12, %v1129_v8  ;;  %vm277_vm12 = vcmp.eq.s32.totalorder %v1262_v17, %v1344_v26 }
  0x53   :  { %947 = vmatpush.msk.msrb.mxu3 %vm114_vm13, %v1129_v8  ;;  %931 = vmatpush.msk.msrb.mxu2 %vm440_vm14, %v1129_v8  ;;  %vm276_vm13 = vcmp.eq.s32.totalorder %v1271_v18, %v1344_v26  ;;  %vm275_vm14 = vcmp.eq.s32.totalorder %v1280_v19, %v1344_v26 }
  0x54   :  { %963 = vmatpush.msk.msrb.mxu0 %vm391_vm15, %v1129_v8  ;;  %880 = vmatpush.msk.msrb.mxu1 %vm280_vm0, %v1129_v8  ;;  %vm274_vm15 = vcmp.eq.s32.totalorder %v1160_v1, %v1344_v26  ;;  %vm786_vm0 = vcmask 1040384  }
  0x55   :  { %948 = vmatpush.msk.msrb.mxu3 %vm113_vm1, %v1129_v8  ;;  %932 = vmatpush.msk.msrb.mxu2 %vm439_vm2, %v1129_v8 }
  0x56   :  { %964 = vmatpush.msk.msrb.mxu0 %vm390_vm3, %v1129_v8  ;;  %881 = vmatpush.msk.msrb.mxu1 %vm279_vm4, %v1129_v8 }
  0x57   :  { %949 = vmatpush.msk.msrb.mxu3 %vm112_vm5, %v1129_v8  ;;  %933 = vmatpush.msk.msrb.mxu2 %vm438_vm6, %v1129_v8 }
  0x58   :  { %965 = vmatpush.msk.msrb.mxu0 %vm389_vm7, %v1129_v8  ;;  %882 = vmatpush.msk.msrb.mxu1 %vm278_vm8, %v1129_v8 }
  0x59   :  { %950 = vmatpush.msk.msrb.mxu3 %vm111_vm9, %v1129_v8  ;;  %934 = vmatpush.msk.msrb.mxu2 %vm437_vm10, %v1129_v8 }
  0x5a   :  { %966 = vmatpush.msk.msrb.mxu0 %vm388_vm11, %v1129_v8  ;;  %245 = vmatmul.f32.gmra.mxu1 %v84_v39 }
  0x5b   :  { %883 = vmatpush.msk.msrb.mxu1 %vm277_vm12, %v1129_v8  ;;  %501 = vmatmul.f32.vlgmr.msrb.gmra.mxu2 %v61_v40 }
  0x5c   :  { %566 = vmatmul.f32.vlgmr.msrb.gmra.mxu3 %v61_v40  ;;  %684 = vmatmul.f32.vlgmr.msrb.gmra.mxu0 %v61_v40 }
  0x5d   :  { %884 = vmatpush.msk.msrb.mxu1 %vm276_vm13, %v1129_v8 }
  0x5f   :  { %885 = vmatpush.msk.msrb.mxu1 %vm275_vm14, %v1129_v8 }
  0x61   :  { %886 = vmatpush.msk.msrb.mxu1 %vm274_vm15, %v1129_v8 }
  0x62   :  { %338 = vmatmul.f32.vlgmr.msrb.gmra.mxu1 %v61_v40 }
  0x63   :  { %504 = vmatmul.f32.gmra.mxu2 %v62_v41 }
  0x64   :  { %569 = vmatmul.f32.gmra.mxu3 %v62_v41  ;;  %687 = vmatmul.f32.gmra.mxu0 %v62_v41 }
  0x6a   :  { %341 = vmatmul.f32.gmra.mxu1 %v62_v41 }
  0x6b   :  { %507 = vmatmul.f32.gmra.mxu2 %v63_v42 }
  0x6c   :  { %572 = vmatmul.f32.gmra.mxu3 %v63_v42  ;;  %690 = vmatmul.f32.gmra.mxu0 %v63_v42 }
  0x72   :  { %344 = vmatmul.f32.gmra.mxu1 %v63_v42 }
  0x73   :  { %510 = vmatmul.f32.gmra.mxu2 %v64_v43 }
  0x74   :  { %575 = vmatmul.f32.gmra.mxu3 %v64_v43  ;;  %693 = vmatmul.f32.gmra.mxu0 %v64_v43 }
  0x7a   :  { %347 = vmatmul.f32.gmra.mxu1 %v64_v43 }
  0x7b   :  { %513 = vmatmul.f32.gmra.mxu2 %v65_v44 }
  0x7c   :  { %578 = vmatmul.f32.gmra.mxu3 %v65_v44  ;;  %696 = vmatmul.f32.gmra.mxu0 %v65_v44 }
  0x82   :  { %350 = vmatmul.f32.gmra.mxu1 %v65_v44 }
  0x83   :  { %516 = vmatmul.f32.gmra.mxu2 %v66_v45 }
  0x84   :  { %581 = vmatmul.f32.gmra.mxu3 %v66_v45  ;;  %699 = vmatmul.f32.gmra.mxu0 %v66_v45 }
  0x8a   :  { %353 = vmatmul.f32.gmra.mxu1 %v66_v45 }
  0x8b   :  { %519 = vmatmul.f32.gmra.mxu2 %v67_v46 }
  0x8c   :  { %584 = vmatmul.f32.gmra.mxu3 %v67_v46  ;;  %702 = vmatmul.f32.gmra.mxu0 %v67_v46 }
  0x92   :  { %356 = vmatmul.f32.gmra.mxu1 %v67_v46 }
  0x93   :  { %522 = vmatmul.f32.gmra.mxu2 %v68_v47 }
  0x94   :  { %587 = vmatmul.f32.gmra.mxu3 %v68_v47  ;;  %705 = vmatmul.f32.gmra.mxu0 %v68_v47 }
  0x9a   :  { %359 = vmatmul.f32.gmra.mxu1 %v68_v47 }
  0x9b   :  { %525 = vmatmul.f32.gmra.mxu2 %v69_v48 }
  0x9c   :  { %590 = vmatmul.f32.gmra.mxu3 %v69_v48  ;;  %708 = vmatmul.f32.gmra.mxu0 %v69_v48 }
  0xa2   :  { %362 = vmatmul.f32.gmra.mxu1 %v69_v48 }
  0xa3   :  { %528 = vmatmul.f32.gmra.mxu2 %v70_v49 }
  0xa4   :  { %593 = vmatmul.f32.gmra.mxu3 %v70_v49  ;;  %711 = vmatmul.f32.gmra.mxu0 %v70_v49 }
  0xaa   :  { %365 = vmatmul.f32.gmra.mxu1 %v70_v49 }
  0xab   :  { %531 = vmatmul.f32.gmra.mxu2 %v71_v50 }
  0xac   :  { %596 = vmatmul.f32.gmra.mxu3 %v71_v50  ;;  %714 = vmatmul.f32.gmra.mxu0 %v71_v50 }
  0xb1   :  { %v225_v52 = vpop.f32.mrf.mxu0 }
  0xb2   :  { %368 = vmatmul.f32.gmra.mxu1 %v71_v50 }
  0xb3   :  { %534 = vmatmul.f32.gmra.mxu2 %v72_v51 }
  0xb4   :  { %599 = vmatmul.f32.gmra.mxu3 %v72_v51  ;;  %717 = vmatmul.f32.gmra.mxu0 %v72_v51 }
  0xb6   :  { %v1540_v56 = vpop.f32.mrf.mxu1 }
  0xb8   :  { %v1536_v54 = vpop.f32.mrf.mxu2  ;;  %v1538_v55 = vpop.f32.mrf.mxu3 }
  0xba   :  { %371 = vmatmul.f32.gmra.mxu1 %v72_v51 }
  0xbb   :  { %537 = vmatmul.f32.gmra.mxu2 %v73_v53  ;;  %v228_v57 = vpop.f32.mrf.mxu0 }
  0xbc   :  { %602 = vmatmul.f32.gmra.mxu3 %v73_v53  ;;  %720 = vmatmul.f32.gmra.mxu0 %v73_v53 }
  0xc0   :  { %v1542_v59 = vpop.f32.mrf.mxu2 }
  0xc1   :  { %v1544_v60 = vpop.f32.mrf.mxu3 }
  0xc2   :  { %374 = vmatmul.f32.gmra.mxu1 %v73_v53 }
  0xc3   :  { %540 = vmatmul.f32.gmra.mxu2 %v74_v58  ;;  %v1546_v61 = vpop.f32.mrf.mxu1 }
  0xc4   :  { %605 = vmatmul.f32.gmra.mxu3 %v74_v58  ;;  %723 = vmatmul.f32.gmra.mxu0 %v74_v58  ;;  %v231_v62 = vpop.f32.mrf.mxu0 }
  0xca   :  { %377 = vmatmul.f32.gmra.mxu1 %v74_v58  ;;  %v1548_v0 = vpop.f32.mrf.mxu2 }
  0xcb   :  { %543 = vmatmul.f32.gmra.mxu2 %v75_v63  ;;  %v1550_v1 = vpop.f32.mrf.mxu3 }
  0xcc   :  { %608 = vmatmul.f32.gmra.mxu3 %v75_v63  ;;  %726 = vmatmul.f32.gmra.mxu0 %v75_v63 }
  0xcd   :  { %v1552_v2 = vpop.f32.mrf.mxu1 }
  0xce   :  { %v234_v3 = vpop.f32.mrf.mxu0 }
  0xd2   :  { %380 = vmatmul.f32.gmra.mxu1 %v75_v63 }
  0xd3   :  { %546 = vmatmul.f32.gmra.mxu2 %v76_v4 }
  0xd4   :  { %611 = vmatmul.f32.gmra.mxu3 %v76_v4  ;;  %729 = vmatmul.f32.gmra.mxu0 %v76_v4  ;;  %v1554_v5 = vpop.f32.mrf.mxu2 }
  0xd5   :  { %v1556_v6 = vpop.f32.mrf.mxu3 }
  0xd7   :  { %v1558_v7 = vpop.f32.mrf.mxu1 }
  0xd9   :  { %v685_v8 = vpop.f32.mrf.mxu0 }
  0xda   :  { %v686_v9 = vadd.f32 %v685_v8, %v225_v52  ;;  %383 = vmatmul.f32.gmra.mxu1 %v76_v4 }
  0xde   :  { %v502_v10 = vpop.f32.mrf.mxu2 }
  0xdf   :  { %v733_v11 = vsub.f32 %v686_v9, %v502_v10  ;;  %v567_v12 = vpop.f32.mrf.mxu3  ;;  %v339_v13 = vpop.f32.mrf.mxu1 }
  0xe0   :  { %v568_v14 = vadd.f32 %v567_v12, %v225_v52 }
  0xe1   :  { %v688_v15 = vpop.f32.mrf.mxu0  ;;  %v749_v23 = vand.u32 2147483647, %v733_v11 }
  0xe2   :  { %v615_v16 = vsub.f32 %v568_v14, %v339_v13  ;;  %v689_v17 = vadd.f32 %v688_v15, %v228_v57 }
  0xe4   :  { %v631_v29 = vand.u32 2147483647, %v615_v16 }
  0xe6   :  { %v505_v18 = vpop.f32.mrf.mxu2 }
  0xe7   :  { %v734_v19 = vsub.f32 %v689_v17, %v505_v18  ;;  %v570_v20 = vpop.f32.mrf.mxu3  ;;  %v342_v21 = vpop.f32.mrf.mxu1 }
  0xe8   :  { %v571_v22 = vadd.f32 %v570_v20, %v228_v57 }
  0xe9   :  { %v750_v24 = vand.u32 2147483647, %v734_v19  ;;  %v691_v25 = vpop.f32.mrf.mxu0 }
  0xea   :  { %v616_v26 = vsub.f32 %v571_v22, %v342_v21  ;;  %v692_v27 = vadd.f32 %v691_v25, %v231_v62 }
  0xeb   :  { %v765_v28 = vadd.f32 %v750_v24, %v749_v23 }
  0xec   :  { %v632_v30 = vand.u32 2147483647, %v616_v26 }
  0xee   :  { %v647_v31 = vadd.f32 %v632_v30, %v631_v29  ;;  %v508_v32 = vpop.f32.mrf.mxu2 }
  0xef   :  { %v735_v33 = vsub.f32 %v692_v27, %v508_v32  ;;  %v573_v34 = vpop.f32.mrf.mxu3  ;;  %v345_v35 = vpop.f32.mrf.mxu1 }
  0xf0   :  { %v574_v36 = vadd.f32 %v573_v34, %v231_v62 }
  0xf1   :  { %v751_v37 = vand.u32 2147483647, %v735_v33  ;;  %v694_v38 = vpop.f32.mrf.mxu0 }
  0xf2   :  { %v617_v39 = vsub.f32 %v574_v36, %v345_v35  ;;  %v695_v40 = vadd.f32 %v694_v38, %v234_v3 }
  0xf3   :  { %v766_v41 = vadd.f32 %v765_v28, %v751_v37 }
  0xf4   :  { %v633_v42 = vand.u32 2147483647, %v617_v39 }
  0xf6   :  { %v648_v43 = vadd.f32 %v647_v31, %v633_v42  ;;  %v511_v44 = vpop.f32.mrf.mxu2 }
  0xf7   :  { %v736_v45 = vsub.f32 %v695_v40, %v511_v44  ;;  %v576_v46 = vpop.f32.mrf.mxu3  ;;  %v348_v47 = vpop.f32.mrf.mxu1 }
  0xf8   :  { %v577_v48 = vadd.f32 %v576_v46, %v234_v3 }
  0xf9   :  { %v752_v49 = vand.u32 2147483647, %v736_v45  ;;  %v697_v50 = vpop.f32.mrf.mxu0 }
  0xfa   :  { %v618_v51 = vsub.f32 %v577_v48, %v348_v47  ;;  %v698_v52 = vadd.f32 %v697_v50, %v1540_v56 }
  0xfb   :  { %v767_v53 = vadd.f32 %v766_v41, %v752_v49 }
  0xfc   :  { %v634_v57 = vand.u32 2147483647, %v618_v51 }
  0xfe   :  { %v649_v58 = vadd.f32 %v648_v43, %v634_v57  ;;  %v514_v62 = vpop.f32.mrf.mxu2 }
  0xff   :  { %v737_v63 = vsub.f32 %v698_v52, %v514_v62  ;;  %v579_v4 = vpop.f32.mrf.mxu3  ;;  %v351_v8 = vpop.f32.mrf.mxu1 }
 0x100   :  { %v580_v9 = vadd.f32 %v579_v4, %v1540_v56 }
 0x101   :  { %v753_v10 = vand.u32 2147483647, %v737_v63  ;;  %v700_v11 = vpop.f32.mrf.mxu0 }
 0x102   :  { %v619_v12 = vsub.f32 %v580_v9, %v351_v8  ;;  %v701_v3 = vadd.f32 %v700_v11, %v1546_v61 }
 0x103   :  { %v768_v13 = vadd.f32 %v767_v53, %v753_v10 }
 0x104   :  { %v635_v14 = vand.u32 2147483647, %v619_v12 }
 0x106   :  { %v650_v15 = vadd.f32 %v649_v58, %v635_v14  ;;  %v517_v16 = vpop.f32.mrf.mxu2 }
 0x107   :  { %v738_v17 = vsub.f32 %v701_v3, %v517_v16  ;;  %v582_v18 = vpop.f32.mrf.mxu3  ;;  %v354_v19 = vpop.f32.mrf.mxu1 }
 0x108   :  { %v583_v20 = vadd.f32 %v582_v18, %v1546_v61 }
 0x109   :  { %v754_v21 = vand.u32 2147483647, %v738_v17  ;;  %v703_v22 = vpop.f32.mrf.mxu0 }
 0x10a   :  { %v620_v23 = vsub.f32 %v583_v20, %v354_v19  ;;  %v704_v56 = vadd.f32 %v703_v22, %v1552_v2 }
 0x10b   :  { %v769_v24 = vadd.f32 %v768_v13, %v754_v21 }
 0x10c   :  { %v636_v25 = vand.u32 2147483647, %v620_v23 }
 0x10e   :  { %v651_v26 = vadd.f32 %v650_v15, %v636_v25  ;;  %v520_v27 = vpop.f32.mrf.mxu2 }
 0x10f   :  { %v739_v28 = vsub.f32 %v704_v56, %v520_v27  ;;  %v585_v29 = vpop.f32.mrf.mxu3  ;;  %v357_v30 = vpop.f32.mrf.mxu1 }
 0x110   :  { %v586_v31 = vadd.f32 %v585_v29, %v1552_v2 }
 0x111   :  { %v755_v32 = vand.u32 2147483647, %v739_v28  ;;  %v706_v33 = vpop.f32.mrf.mxu0 }
 0x112   :  { %v621_v34 = vsub.f32 %v586_v31, %v357_v30  ;;  %v707_v61 = vadd.f32 %v706_v33, %v1558_v7 }
 0x113   :  { %v770_v35 = vadd.f32 %v769_v24, %v755_v32 }
 0x114   :  { %v637_v36 = vand.u32 2147483647, %v621_v34 }
 0x116   :  { %v652_v37 = vadd.f32 %v651_v26, %v637_v36  ;;  %v523_v38 = vpop.f32.mrf.mxu2 }
 0x117   :  { %v740_v39 = vsub.f32 %v707_v61, %v523_v38  ;;  %v588_v40 = vpop.f32.mrf.mxu3  ;;  %v360_v41 = vpop.f32.mrf.mxu1 }
 0x118   :  { %v589_v42 = vadd.f32 %v588_v40, %v1558_v7 }
 0x119   :  { %v756_v43 = vand.u32 2147483647, %v740_v39  ;;  %v709_v44 = vpop.f32.mrf.mxu0 }
 0x11a   :  { %v622_v45 = vsub.f32 %v589_v42, %v360_v41  ;;  %v710_v15 = vadd.f32 %v709_v44, %v1536_v54 }
 0x11b   :  { %v771_v46 = vadd.f32 %v770_v35, %v756_v43 }
 0x11c   :  { %v638_v47 = vand.u32 2147483647, %v622_v45 }
 0x11e   :  { %v653_v2 = vadd.f32 %v652_v37, %v638_v47  ;;  %v526_v48 = vpop.f32.mrf.mxu2 }
 0x11f   :  { %v591_v49 = vpop.f32.mrf.mxu3  ;;  %v363_v50 = vpop.f32.mrf.mxu1  ;;  %v741_v17 = vsub.f32 %v710_v15, %v526_v48 }
 0x120   :  { %v592_v16 = vadd.f32 %v591_v49, %v1536_v54 }
 0x121   :  { %v712_v51 = vpop.f32.mrf.mxu0  ;;  %v757_v26 = vand.u32 2147483647, %v741_v17 }
 0x122   :  { %v713_v18 = vadd.f32 %v712_v51, %v1542_v59  ;;  %v623_v25 = vsub.f32 %v592_v16, %v363_v50 }
 0x123   :  { %v772_v36 = vadd.f32 %v771_v46, %v757_v26 }
 0x124   :  { %v639_v33 = vand.u32 2147483647, %v623_v25 }
 0x126   :  { %v529_v52 = vpop.f32.mrf.mxu2  ;;  %v654_v48 = vadd.f32 %v653_v2, %v639_v33 }
 0x127   :  { %v594_v53 = vpop.f32.mrf.mxu3  ;;  %v366_v57 = vpop.f32.mrf.mxu1  ;;  %v742_v21 = vsub.f32 %v713_v18, %v529_v52 }
 0x128   :  { %v595_v19 = vadd.f32 %v594_v53, %v1542_v59 }
 0x129   :  { %v715_v58 = vpop.f32.mrf.mxu0  ;;  %v758_v31 = vand.u32 2147483647, %v742_v21 }
 0x12a   :  { %v716_v22 = vadd.f32 %v715_v58, %v1548_v0  ;;  %v624_v54 = vsub.f32 %v595_v19, %v366_v57 }
 0x12b   :  { %v773_v42 = vadd.f32 %v772_v36, %v758_v31 }
 0x12c   :  { %v640_v38 = vand.u32 2147483647, %v624_v54 }
 0x12e   :  { %v532_v62 = vpop.f32.mrf.mxu2  ;;  %v655_v53 = vadd.f32 %v654_v48, %v640_v38 }
 0x12f   :  { %v597_v63 = vpop.f32.mrf.mxu3  ;;  %v369_v4 = vpop.f32.mrf.mxu1  ;;  %v743_v27 = vsub.f32 %v716_v22, %v532_v62 }
 0x130   :  { %v598_v56 = vadd.f32 %v597_v63, %v1548_v0 }
 0x131   :  { %v718_v8 = vpop.f32.mrf.mxu0  ;;  %v759_v61 = vand.u32 2147483647, %v743_v27 }
 0x132   :  { %v719_v28 = vadd.f32 %v718_v8, %v1554_v5  ;;  %v625_v34 = vsub.f32 %v598_v56, %v369_v4 }
 0x133   :  { %v774_v50 = vadd.f32 %v773_v42, %v759_v61 }
 0x134   :  { %v641_v49 = vand.u32 2147483647, %v625_v34 }
 0x136   :  { %v535_v9 = vpop.f32.mrf.mxu2  ;;  %v656_v4 = vadd.f32 %v655_v53, %v641_v49 }
 0x137   :  { %v600_v7 = vpop.f32.mrf.mxu3  ;;  %v372_v10 = vpop.f32.mrf.mxu1  ;;  %v744_v32 = vsub.f32 %v719_v28, %v535_v9 }
 0x138   :  { %v601_v30 = vadd.f32 %v600_v7, %v1554_v5 }
 0x139   :  { %v721_v11 = vpop.f32.mrf.mxu0  ;;  %v760_v5 = vand.u32 2147483647, %v744_v32 }
 0x13a   :  { %v722_v59 = vadd.f32 %v721_v11, %v1538_v55  ;;  %v626_v39 = vsub.f32 %v601_v30, %v372_v10 }
 0x13b   :  { %v775_v62 = vadd.f32 %v774_v50, %v760_v5 }
 0x13c   :  { %v642_v57 = vand.u32 2147483647, %v626_v39 }
 0x13e   :  { %v538_v12 = vpop.f32.mrf.mxu2  ;;  %v657_v11 = vadd.f32 %v656_v4, %v642_v57 }
 0x13f   :  { %v603_v13 = vpop.f32.mrf.mxu3  ;;  %v375_v14 = vpop.f32.mrf.mxu1  ;;  %v745_v37 = vsub.f32 %v722_v59, %v538_v12 }
 0x140   :  { %v604_v35 = vadd.f32 %v603_v13, %v1538_v55 }
 0x141   :  { %v724_v3 = vpop.f32.mrf.mxu0  ;;  %v761_v51 = vand.u32 2147483647, %v745_v37 }
 0x142   :  { %v725_v0 = vadd.f32 %v724_v3, %v1544_v60  ;;  %v627_v55 = vsub.f32 %v604_v35, %v375_v14 }
 0x143   :  { %v776_v7 = vadd.f32 %v775_v62, %v761_v51 }
 0x144   :  { %v643_v8 = vand.u32 2147483647, %v627_v55 }
 0x146   :  { %v541_v20 = vpop.f32.mrf.mxu2  ;;  %v658_v16 = vadd.f32 %v657_v11, %v643_v8 }
 0x147   :  { %v606_v23 = vpop.f32.mrf.mxu3  ;;  %v378_v24 = vpop.f32.mrf.mxu1  ;;  %v746_v43 = vsub.f32 %v725_v0, %v541_v20 }
 0x148   :  { %v607_v40 = vadd.f32 %v606_v23, %v1544_v60 }
 0x149   :  { %v727_v29 = vpop.f32.mrf.mxu0  ;;  %v762_v63 = vand.u32 2147483647, %v746_v43 }
 0x14a   :  { %v728_v44 = vadd.f32 %v727_v29, %v1550_v1  ;;  %v628_v58 = vsub.f32 %v607_v40, %v378_v24 }
 0x14c   :  { %v644_v12 = vand.u32 2147483647, %v628_v58 }
 0x14e   :  { %v544_v41 = vpop.f32.mrf.mxu2  ;;  %v659_v21 = vadd.f32 %v658_v16, %v644_v12 }
 0x14f   :  { %v609_v45 = vpop.f32.mrf.mxu3  ;;  %v381_v47 = vpop.f32.mrf.mxu1  ;;  %v747_v52 = vsub.f32 %v728_v44, %v544_v41 }
 0x150   :  { %v610_v46 = vadd.f32 %v609_v45, %v1550_v1  ;;  %v777_v1 = vadd.f32 %v776_v7, %v762_v63 }
 0x151   :  { %v730_v60 = vpop.f32.mrf.mxu0  ;;  %v763_v10 = vand.u32 2147483647, %v747_v52 }
 0x152   :  { %v629_v9 = vsub.f32 %v610_v46, %v381_v47  ;;  %v731_v2 = vadd.f32 %v730_v60, %v1556_v6 }
 0x153   :  { %v778_v19 = vadd.f32 %v777_v1, %v763_v10 }
 0x154   :  { %v645_v17 = vand.u32 2147483647, %v629_v9 }
 0x156   :  { %v547_v13 = vpop.f32.mrf.mxu2  ;;  %v660_v24 = vadd.f32 %v659_v21, %v645_v17 }
 0x157   :  { %v748_v14 = vsub.f32 %v731_v2, %v547_v13  ;;  %v612_v3 = vpop.f32.mrf.mxu3  ;;  %v384_v15 = vpop.f32.mrf.mxu1 }
 0x158   :  { %v613_v18 = vadd.f32 %v612_v3, %v1556_v6 }
 0x159   :  { %v764_v20 = vand.u32 2147483647, %v748_v14 }
 0x15a   :  { %v630_v22 = vsub.f32 %v613_v18, %v384_v15 }
 0x15b   :  { %v779_v23 = vadd.f32 %v778_v19, %v764_v20 }
 0x15c   :  { %v646_v25 = vand.u32 2147483647, %v630_v22 }
 0x15d   :  { %v780_v56 = vrot.slane %v779_v23, 4 }
 0x15e   :  { %v661_v26 = vadd.f32 %v660_v24, %v646_v25 }
 0x15f   :  { %v781_v27 = vadd.f32 %v780_v56, %v779_v23 }
 0x160   :  { %v662_v28 = vrot.slane %v661_v26, 4 }
 0x161   :  { %v782_v29 = vrot.slane %v781_v27, 2 }
 0x162   :  { %v663_v54 = vadd.f32 %v662_v28, %v661_v26 }
 0x163   :  { %v783_v30 = vadd.f32 %v782_v29, %v781_v27 }
 0x164   :  { %v664_v31 = vrot.slane %v663_v54, 2 }
 0x165   :  { %v784_v32 = vrot.slane %v783_v30, 1 }
 0x166   :  { %v665_v59 = vadd.f32 %v664_v31, %v663_v54 }
 0x167   :  { %v785_v34 = vadd.f32 %v784_v32, %v783_v30 }
 0x168   :  { %v666_v33 = vrot.slane %v665_v59, 1 }
 0x16a   :  { %v667_v6 = vadd.f32 %v666_v33, %v665_v59 }
 0x16c   :  { %v787_v35 = vsel %vm786_vm0, %v667_v6, %v785_v34 }
 0x16d   :  { %788 = vst [vmem:[#allocation8] sm:$0x3] %v787_v35 }
 0x16e   :  { %799 = dma.vmem_to_hbm [thread:$0]  %s795_s2, 32, %s797_s30, [#allocation4]  }
 0x16f   :  { %1122 = dma.done.wait [#allocation4], 32  }
 0x170   :  { %1123 = vsyncadd [#allocation4], 4294967264 }
 0x171   :  { %804 = vsyncpa [#allocation3], 1 }
 0x172   :  { %805 = vsyncpa [#allocation6], 1 }
 0x173   :  { %806 = vsyncpa [#allocation4], 1 }

</bundles_post_ra>
